<compile_context>
chip_gen: v7x
topology: tpu7x:2x2x1
jax: 0.10.0
libtpu: 0.0.40
codegen_flags: <defaults>
</compile_context>

<pallas_src>
import numpy as np
import jax
import jax.numpy as jnp
from jax.experimental import pallas as pl
from jax.experimental.pallas import tpu as pltpu


def _round_up(x, m):
    return ((x + m - 1) // m) * m


def _num_tensorcores():
    """TensorCores addressable by one pallas_call via the parallel grid axis."""
    try:
        kind = (getattr(jax.devices()[0], "device_kind", "") or "").lower()
        if "v7" in kind or "v4" in kind:   # megacore-style: 2 TCs per device
            return 2
    except Exception:
        pass
    return 1


# ----------------------------------------------------------------------------
# Deterministic parameter init (replicates torch orthogonal_ + zero bias)
# ----------------------------------------------------------------------------
def orthogonal_init(key, out_dim, in_dim, gain):
    """Orthogonal init for a torch-shaped weight (out_dim, in_dim)."""
    rows, cols = out_dim, in_dim
    a = jax.random.normal(key, (max(rows, cols), min(rows, cols)), jnp.float32)
    q, r = jnp.linalg.qr(a)
    d = jnp.diag(r)
    q = q * jnp.where(d >= 0, 1.0, -1.0)   # sign fix (avoid 0 from exact zeros)
    if rows < cols:
        q = q.T
    return (gain * q[:rows, :cols]).astype(jnp.float32)


def make_mlp_params(key, layer_sizes, gains):
    """layer_sizes = [in, h1, ..., out]; returns list of (W_T, b) per layer.

    W_T has shape (in_dim, out_dim) so forward is  h @ W_T + b.
    """
    params = []
    keys = jax.random.split(key, len(layer_sizes) - 1)
    for i in range(len(layer_sizes) - 1):
        in_d, out_d = layer_sizes[i], layer_sizes[i + 1]
        w_torch = orthogonal_init(keys[i], out_d, in_d, gains[i])  # (out, in)
        params.append((w_torch.T, jnp.zeros((out_d,), jnp.float32)))
    return params


# ----------------------------------------------------------------------------
# Pack actor + critic into ONE weight/bias slab (single VMEM-resident input)
# ----------------------------------------------------------------------------
def pack_actor_critic(actor_params, critic_params, obs_dim):
    """Returns (slab, meta).

    Slab row layout (all f32, w_pad = 128-lane width):
      rows [0, obs_pad)                      : layer-0 [W1_actor | W1_critic]
      rows [obs_pad + (i-1)*w_pad, +w_pad)   : layer-i block-diag(Wa_i, Wc_i)
      last 8 rows                            : per-layer bias rows [ba_i | bc_i]
    Actor outputs occupy lanes [0, a_w[i]); critic outputs follow them.
    """
    n_layers = len(actor_params)
    assert len(critic_params) == n_layers
    a_w = [int(w.shape[1]) for w, _ in actor_params]
    c_w = [int(w.shape[1]) for w, _ in critic_params]
    obs_pad = _round_up(obs_dim, 8)
    w_pad = _round_up(max(aw + cw for aw, cw in zip(a_w, c_w)), 128)
    bias_rows = _round_up(n_layers, 8)
    bias_row0 = obs_pad + (n_layers - 1) * w_pad
    k_total = bias_row0 + bias_rows

    slab = np.zeros((k_total, w_pad), np.float32)
    row_offsets = []

    # layer 0: both nets read the same obs features
    wa0, _ = actor_params[0]
    wc0, _ = critic_params[0]
    slab[:obs_dim, :a_w[0]] = np.asarray(wa0)
    slab[:obs_dim, a_w[0]:a_w[0] + c_w[0]] = np.asarray(wc0)
    row_offsets.append((0, obs_dim))

    # deeper layers: block-diagonal (actor block, then critic block)
    for i in range(1, n_layers):
        r0 = obs_pad + (i - 1) * w_pad
        wa, _ = actor_params[i]
        wc, _ = critic_params[i]
        slab[r0:r0 + a_w[i - 1], :a_w[i]] = np.asarray(wa)
        slab[r0 + a_w[i - 1]:r0 + a_w[i - 1] + c_w[i - 1],
             a_w[i]:a_w[i] + c_w[i]] = np.asarray(wc)
        row_offsets.append((r0, r0 + w_pad))

    # bias rows
    for i in range(n_layers):
        _, ba = actor_params[i]
        _, bc = critic_params[i]
        slab[bias_row0 + i, :a_w[i]] = np.asarray(ba)
        slab[bias_row0 + i, a_w[i]:a_w[i] + c_w[i]] = np.asarray(bc)

    meta = dict(row_offsets=tuple(row_offsets), bias_row0=bias_row0,
                n_layers=n_layers, obs_dim=obs_dim, w_pad=w_pad,
                a_w=tuple(a_w), c_w=tuple(c_w))
    return jnp.asarray(slab), meta


# ----------------------------------------------------------------------------
# Fused Pallas kernel: both MLPs in one pass (Linear + Tanh hidden, Linear out)
# ----------------------------------------------------------------------------
def _make_fused_kernel(meta):
    row_offsets = meta["row_offsets"]
    bias_row0 = meta["bias_row0"]
    n_layers = meta["n_layers"]

    def kernel(x_ref, w_ref, o_ref):
        h = x_ref[...]                                   # (tb, obs_dim) f32
        for i in range(n_layers):
            r0, r1 = row_offsets[i]                      # static slices: free
            h = jnp.dot(h, w_ref[r0:r1, :],
                        preferred_element_type=jnp.float32)
            h = h + w_ref[bias_row0 + i:bias_row0 + i + 1, :]   # bias row
            if i < n_layers - 1:
                h = jnp.tanh(h)
        o_ref[...] = h.astype(o_ref.dtype)               # lane-dense 128-wide

    return kernel


def _pick_batch_tile(batch, num_tc, single_tile_cap=2048, multi_tile_cap=8192):
    """Generation-aware batch tile.

    1 TC (v5e/v6e): one grid tile (grid is a sequential loop; per-step overhead
    dominates this tiny net), capped so VMEM stays well inside default limits.
    2 TC (v7x):     >= 2 tiles so both TensorCores get work, tile <= 8192 rows
    to stay inside v7x's 64 MiB physical VMEM.
    """
    if num_tc >= 2 and batch >= 16:
        b8 = _round_up(batch, 8)
        n_tiles = max(num_tc, pl.cdiv(b8, multi_tile_cap))
        return _round_up(pl.cdiv(b8, n_tiles), 8)
    if batch <= single_tile_cap:
        return batch            # block == full batch extent (always legal)
    return single_tile_cap      # trailing partial block masked by Pallas


def actor_critic_forward(obs, w_slab, meta, act_dim):
    """obs: (batch, obs_dim) f32 -> (actor_out (batch, act_dim), value (batch, 1))."""
    batch, obs_dim = obs.shape
    assert obs_dim == meta["obs_dim"]
    w_pad = meta["w_pad"]
    n_layers = meta["n_layers"]

    num_tc = _num_tensorcores()
    tb = _pick_batch_tile(batch, num_tc)
    grid = (pl.cdiv(batch, tb),)

    flops = 2 * batch * (obs_dim * w_pad + (n_layers - 1) * w_pad * w_pad)
    transcendentals = batch * w_pad * (n_layers - 1)
    bytes_accessed = 4 * (batch * obs_dim + int(w_slab.size) + batch * w_pad)

    out = pl.pallas_call(
        _make_fused_kernel(meta),
        out_shape=jax.ShapeDtypeStruct((batch, w_pad), jnp.float32),
        grid=grid,
        in_specs=[
            pl.BlockSpec((tb, obs_dim), lambda i: (i, 0)),       # obs tile
            pl.BlockSpec(w_slab.shape, lambda i: (0, 0)),        # resident slab
        ],
        out_specs=pl.BlockSpec((tb, w_pad), lambda i: (i, 0)),
        compiler_params=pltpu.CompilerParams(
            dimension_semantics=("parallel",)),                  # 2-TC split on v7x
        cost_estimate=pl.CostEstimate(flops=flops,
                                      transcendentals=transcendentals,
                                      bytes_accessed=bytes_accessed),
    )(obs, w_slab)

    act_net = out[:, :act_dim]
    val_net = out[:, act_dim:act_dim + 1]
    return act_net, val_net


# Plain-JAX reference for validation (per-net, unpacked params)
def mlp_reference(obs, params):
    h = obs
    n = len(params)
    for i, (w, b) in enumerate(params):
        h = h @ w + b
        if i < n - 1:
            h = jnp.tanh(h)
    return h


if __name__ == "__main__":
    # Small shapes consistent with the module (continuous-action Box env):
    obs_dim = 8
    act_dim = 4
    hidden_sizes_actor = [32, 32]
    hidden_sizes_critic = [32, 32]

    key = jax.random.PRNGKey(0)
    k_obs, k_actor, k_critic = jax.random.split(key, 3)

    # Actor: hidden layers gain=sqrt(2), output layer gain=0.01
    actor_sizes = [obs_dim] + hidden_sizes_actor + [act_dim]
    actor_gains = [float(np.sqrt(2))] * len(hidden_sizes_actor) + [0.01]
    actor_params = make_mlp_params(k_actor, actor_sizes, actor_gains)

    # Critic: hidden layers gain=sqrt(2), output layer gain=1
    critic_sizes = [obs_dim] + hidden_sizes_critic + [1]
    critic_gains = [float(np.sqrt(2))] * len(hidden_sizes_critic) + [1.0]
    critic_params = make_mlp_params(k_critic, critic_sizes, critic_gains)

    w_slab, meta = pack_actor_critic(actor_params, critic_params, obs_dim)

    # --- primary small-batch run (single grid point, no padding anywhere) ---
    batch = 4
    obs = jax.random.normal(k_obs, (batch, obs_dim), jnp.float32)
    act_net, val_net = jax.block_until_ready(
        actor_critic_forward(obs, w_slab, meta, act_dim))

    act_ref = mlp_reference(obs, actor_params)
    val_ref = mlp_reference(obs, critic_params)
    assert act_net.shape == (batch, act_dim)
    assert val_net.shape == (batch, 1)
    np.testing.assert_allclose(np.asarray(act_net), np.asarray(act_ref),
                               rtol=1e-5, atol=1e-5)
    np.testing.assert_allclose(np.asarray(val_net), np.asarray(val_ref),
                               rtol=1e-5, atol=1e-5)

    # --- ragged batch exercises partial/full-extent blocks (no round-to-256 pad) ---
    batch2 = 300
    obs2 = jax.random.normal(jax.random.PRNGKey(1), (batch2, obs_dim), jnp.float32)
    act2, val2 = jax.block_until_ready(
        actor_critic_forward(obs2, w_slab, meta, act_dim))
    np.testing.assert_allclose(np.asarray(act2),
                               np.asarray(mlp_reference(obs2, actor_params)),
                               rtol=1e-5, atol=1e-5)
    np.testing.assert_allclose(np.asarray(val2),
                               np.asarray(mlp_reference(obs2, critic_params)),
                               rtol=1e-5, atol=1e-5)

    # TODO(synk): actor distribution methods (sample/log_prob/entropy/KL) and the
    # log_std parameter are distribution-level utilities outside
    # MLPActorCritic.forward and are intentionally not ported to the kernel.
    # TODO(synk): optional bf16 dot-input / bf16 output path for very large
    # rollout batches (v5e/v6e MXU) is left out to preserve 1e-5 numerics.
    print("KERNEL_OK")
</pallas_src>

<mosaic_0001>
module attributes {stable_mosaic.version = 11 : i64} {
  func.func @kernel(%arg0: i32, %arg1: memref<4x8xf32, #tpu.memory_space<vmem>>, %arg2: memref<272x128xf32, #tpu.memory_space<vmem>>, %arg3: memref<4x128xf32, #tpu.memory_space<vmem>>) attributes {dimension_semantics = [#tpu.dimension_semantics<parallel>], iteration_bounds = array<i64: 1>, scalar_prefetch = 0 : i64, scratch_operands = 0 : i64, tpu.core_type = #tpu.core_type<tc>, window_params = [{transform_indices = @transform_0, window_bounds = array<i64: 4, 8>}, {pipeline_mode = #tpu.pipeline_mode<synchronous>, transform_indices = @transform_1, window_bounds = array<i64: 272, 128>}, {transform_indices = @transform_2, window_bounds = array<i64: 4, 128>}]} {
    %c0 = arith.constant 0 : index
    %c0_0 = arith.constant 0 : index
    %0 = vector.load %arg1[%c0, %c0_0] : memref<4x8xf32, #tpu.memory_space<vmem>>, vector<4x8xf32>
    %c0_1 = arith.constant 0 : index
    %c0_2 = arith.constant 0 : index
    %1 = vector.load %arg2[%c0_1, %c0_2] : memref<272x128xf32, #tpu.memory_space<vmem>>, vector<8x128xf32>
    %cst = arith.constant dense<0.000000e+00> : vector<4x128xf32>
    %2 = tpu.matmul %0, %1, %cst {dimension_numbers = #tpu.dot_dimension_numbers<[1], [0], [0], [1], [0, 0, 1, 1], [], []>} : vector<4x8xf32>, vector<8x128xf32>, vector<4x128xf32> -> vector<4x128xf32>
    %c264 = arith.constant 264 : index
    %c0_3 = arith.constant 0 : index
    %3 = vector.load %arg2[%c264, %c0_3] : memref<272x128xf32, #tpu.memory_space<vmem>>, vector<1x128xf32>
    %4 = vector.broadcast %3 : vector<1x128xf32> to vector<4x128xf32>
    %5 = arith.addf %2, %4 : vector<4x128xf32>
    %6 = math.tanh %5 : vector<4x128xf32>
    %c8 = arith.constant 8 : index
    %c0_4 = arith.constant 0 : index
    %7 = vector.load %arg2[%c8, %c0_4] : memref<272x128xf32, #tpu.memory_space<vmem>>, vector<128x128xf32>
    %cst_5 = arith.constant dense<0.000000e+00> : vector<4x128xf32>
    %8 = tpu.matmul %6, %7, %cst_5 {dimension_numbers = #tpu.dot_dimension_numbers<[1], [0], [0], [1], [0, 0, 1, 1], [], []>} : vector<4x128xf32>, vector<128x128xf32>, vector<4x128xf32> -> vector<4x128xf32>
    %c265 = arith.constant 265 : index
    %c0_6 = arith.constant 0 : index
    %9 = vector.load %arg2[%c265, %c0_6] : memref<272x128xf32, #tpu.memory_space<vmem>>, vector<1x128xf32>
    %10 = vector.broadcast %9 : vector<1x128xf32> to vector<4x128xf32>
    %11 = arith.addf %8, %10 : vector<4x128xf32>
    %12 = math.tanh %11 : vector<4x128xf32>
    %c136 = arith.constant 136 : index
    %c0_7 = arith.constant 0 : index
    %13 = vector.load %arg2[%c136, %c0_7] : memref<272x128xf32, #tpu.memory_space<vmem>>, vector<128x128xf32>
    %cst_8 = arith.constant dense<0.000000e+00> : vector<4x128xf32>
    %14 = tpu.matmul %12, %13, %cst_8 {dimension_numbers = #tpu.dot_dimension_numbers<[1], [0], [0], [1], [0, 0, 1, 1], [], []>} : vector<4x128xf32>, vector<128x128xf32>, vector<4x128xf32> -> vector<4x128xf32>
    %c266 = arith.constant 266 : index
    %c0_9 = arith.constant 0 : index
    %15 = vector.load %arg2[%c266, %c0_9] : memref<272x128xf32, #tpu.memory_space<vmem>>, vector<1x128xf32>
    %16 = vector.broadcast %15 : vector<1x128xf32> to vector<4x128xf32>
    %17 = arith.addf %14, %16 : vector<4x128xf32>
    %c0_10 = arith.constant 0 : index
    %c0_11 = arith.constant 0 : index
    %18 = vector.load %arg3[%c0_10, %c0_11] : memref<4x128xf32, #tpu.memory_space<vmem>>, vector<4x128xf32>
    tpu.vector_store %arg3[%c0_10, %c0_11], %17 {strides = array<i32>} : memref<4x128xf32, #tpu.memory_space<vmem>>, vector<4x128xf32>,
    return
  }
  func.func @transform_0(%arg0: i32) -> (i32, i32) {
    %c0_i32 = arith.constant 0 : i32
    %c0_i32_0 = arith.constant 0 : i32
    return %arg0, %c0_i32 : i32, i32
  }
  func.func @transform_1(%arg0: i32) -> (i32, i32) {
    %c0_i32 = arith.constant 0 : i32
    %c0_i32_0 = arith.constant 0 : i32
    %c0_i32_1 = arith.constant 0 : i32
    return %c0_i32, %c0_i32_0 : i32, i32
  }
  func.func @transform_2(%arg0: i32) -> (i32, i32) {
    %c0_i32 = arith.constant 0 : i32
    %c0_i32_0 = arith.constant 0 : i32
    return %arg0, %c0_i32 : i32, i32
  }
}

</mosaic_0001>

<bundles_post_ra>
// kernel: tpu_custom_call.1
= control target key start
LH: loop header
LB: loop body
LE: loop exit
PB: predicated region body
PF: predicated region fallthrough
CT: control target
= control target key end

     0   :  { %7 = vsyncpa [#allocation3], 0  ;;  %s652_s0 = inlined_call_operand.hbm [shape: f32[4,8], index: 0, kind: input, shape index: {}]   ;;  %s653_s1 = inlined_call_operand.hbm [shape: f32[272,128], index: 1, kind: input, shape index: {}]   ;;  %s654_s2 = inlined_call_operand.hbm [shape: f32[4,128], index: 2, kind: output, shape index: {}]  }
   0x1   :  { %8 = vsyncpa [#allocation6], 0 }
   0x2   :  { %9 = vsyncpa [#allocation4], 0  ;;  %s567_s9 = smov [#allocation2]   ;;  %s568_s11 = smov [#allocation5]  }
   0x3   :  { %s16_s10 = sshll.u32 %s567_s9, 4  ;;  %s25_s12 = sshll.u32 %s568_s11, 4  ;;  %s17_s10 = int_to_ptr.vmem [resolvable:$true] %s16_s10  ;;  %s590_s12 = int_to_ptr.vmem [resolvable:$true] %s25_s12 }
   0x4   :  { %s495_s15 = scalar_lea.hbm %s652_s0, 64 }
   0x5   :  { %p496_p0 = scmp.ne.s32.totalorder %s652_s0, %s495_s15  ;;  %p499_p1 = scmp.lt.u32.totalorder %s495_s15, %s652_s0 }
   0x7   :  { %p501_p2 = pnand %p499_p1, %p496_p0 }
   0x9   :  { %504 = shalt.err (!%p501_p2)
}
   0xa   :  { %s505_s20 = scalar_lea.vmem %s17_s10, 64  ;;  %p510_p4 = scmp.lt.s32.totalorder %s17_s10, %s17_s10 }
   0xb   :  { %p506_p3 = scmp.ne.s32.totalorder %s17_s10, %s505_s20  ;;  %p511_p5 = scmp.lt.s32.totalorder %s505_s20, %s505_s20 }
   0xd   :  { %p512_p6 = por %p511_p5, %p510_p4 }
   0xf   :  { %p513_p7 = pnand %p512_p6, %p506_p3 }
  0x11   :  { %516 = shalt.err (!%p513_p7)
}
  0x12   :  { %19 = dma.hbm_to_vmem [thread:$0]  %s652_s0, 64, %s17_s10, [#allocation3]  }
  0x13   :  { %s517_s25 = scalar_lea.hbm %s653_s1, 4352 }
  0x14   :  { %p518_p8 = scmp.ne.s32.totalorder %s653_s1, %s517_s25  ;;  %p521_p9 = scmp.lt.u32.totalorder %s517_s25, %s653_s1 }
  0x16   :  { %p523_p10 = pnand %p521_p9, %p518_p8 }
  0x18   :  { %526 = shalt.err (!%p523_p10)
}
  0x19   :  { %s527_s30 = scalar_lea.vmem %s590_s12, 4352  ;;  %p532_p12 = scmp.lt.s32.totalorder %s590_s12, %s590_s12 }
  0x1a   :  { %p528_p11 = scmp.ne.s32.totalorder %s590_s12, %s527_s30  ;;  %p533_p13 = scmp.lt.s32.totalorder %s527_s30, %s527_s30 }
  0x1c   :  { %p534_p0 = por %p533_p13, %p532_p12 }
  0x1e   :  { %p535_p1 = pnand %p534_p0, %p528_p11 }
  0x20   :  { %538 = shalt.err (!%p535_p1)
}
  0x21   :  { %s569_s0 = smov 128   ;;  %s570_s3 = smov 8  }
  0x22   :  { %31 = dma.hbm_to_vmem [thread:$0]  %s653_s1, 4352, %s590_s12, [#allocation6], %s569_s0, %s569_s0, %s570_s3  }
  0x23   :  { %561 = dma.done.wait [#allocation3], 64  }
  0x24   :  { %562 = vsyncadd [#allocation3], 4294967232 }
  0x25   :  { %563 = dma.done.wait [#allocation6], 4352  }
  0x26   :  { %564 = vsyncadd [#allocation6], 4294962944  ;;  %v571_v0 = vmov 0.0   ;;  %vm572_vm0 = vmmov 0   ;;  %v573_v1 = vmov 0.0|0.0   ;;  %vm45_vm1 = vcmask 64512  }
  0x27   :  { %360 = vmatprep.subr.mxu0 %v571_v0  ;;  %362 = vmatprep.mubr.msk.f32.mxu0 %vm572_vm0, %v571_v0  ;;  %v39_v2 = vld [vmem:[#allocation5] sm:$0xff]  ;;  %v38_v3 = vld [vmem:[#allocation2] sm:$0xf]  ;;  %v120_v4 = vld [vmem:[#allocation5 + $0x8] sm:$0xff]  ;;  %s574_s1 = smov [#allocation7]  }
  0x28   :  { %435 = vmatprep.subr.bf16.mxu1 %v573_v1  ;;  %397 = vmatprep.mubr.msk.f32.mxu1 %vm572_vm0, %v571_v0  ;;  %v121_v5 = vld [vmem:[#allocation5 + $0x10] sm:$0xff]  ;;  %v122_v6 = vld [vmem:[#allocation5 + $0x18] sm:$0xff]  ;;  %v123_v7 = vld [vmem:[#allocation5 + $0x20] sm:$0xff]  ;;  %s310_s6 = sshll.u32 %s574_s1, 4  ;;  %s311_s6 = int_to_ptr.vmem [resolvable:$true] %s310_s6 }
  0x29   :  { %361 = vmatpush3.msra.mxu0 %v39_v2  ;;  %v436_v8 = vpack.c.bf16 %v121_v5, %v120_v4  ;;  %v439_v9 = vpack.c.bf16 %v123_v7, %v122_v6  ;;  %v124_v10 = vld [vmem:[#allocation5 + $0x28] sm:$0xff]  ;;  %v125_v11 = vld [vmem:[#allocation5 + $0x30] sm:$0xff]  ;;  %v126_v13 = vld [vmem:[#allocation5 + $0x38] sm:$0xff]  ;;  %s539_s7 = scalar_lea.vmem %s311_s6, 64  ;;  %p544_p3 = scmp.lt.s32.totalorder %s311_s6, %s311_s6 }
  0x2a   :  { %363 = vmatmul.mubr.msk.f32.vlgmr.msra.gmra.mrb[0].mxu0 %vm45_vm1, %v38_v3  ;;  %459 = vmatprep.subr.bf16.mxu0 %v573_v1  ;;  %v442_v12 = vpack.c.bf16 %v125_v11, %v124_v10  ;;  %v127_v14 = vld [vmem:[#allocation5 + $0x40] sm:$0xff]  ;;  %v128_v16 = vld [vmem:[#allocation5 + $0x48] sm:$0xff]  ;;  %v129_v17 = vld [vmem:[#allocation5 + $0x50] sm:$0xff]  ;;  %p540_p2 = scmp.ne.s32.totalorder %s311_s6, %s539_s7  ;;  %p545_p4 = scmp.lt.s32.totalorder %s539_s7, %s539_s7 }
  0x2b   :  { %432 = vmatprep.mubr.msk.f32.mxu0 %vm572_vm0, %v571_v0  ;;  %437 = vmatpush3.bf16.msra.mxu1 %v436_v8  ;;  %v445_v15 = vpack.c.bf16 %v127_v14, %v126_v13  ;;  %v448_v18 = vpack.c.bf16 %v129_v17, %v128_v16  ;;  %v130_v19 = vld [vmem:[#allocation5 + $0x58] sm:$0xff]  ;;  %v131_v20 = vld [vmem:[#allocation5 + $0x60] sm:$0xff]  ;;  %v132_v22 = vld [vmem:[#allocation5 + $0x68] sm:$0xff] }
  0x2c   :  { %438 = vmatprep.subr.bf16.mxu1 %v573_v1  ;;  %v451_v21 = vpack.c.bf16 %v131_v20, %v130_v19  ;;  %v133_v23 = vld [vmem:[#allocation5 + $0x70] sm:$0xff]  ;;  %v134_v25 = vld [vmem:[#allocation5 + $0x78] sm:$0xff]  ;;  %v135_v26 = vld [vmem:[#allocation5 + $0x80] sm:$0xff]  ;;  %p546_p5 = por %p545_p4, %p544_p3 }
  0x2d   :  { %v454_v24 = vpack.c.bf16 %v133_v23, %v132_v22  ;;  %v457_v27 = vpack.c.bf16 %v135_v26, %v134_v25  ;;  %v212_v28 = vld [vmem:[#allocation5 + $0x88] sm:$0xff]  ;;  %v213_v29 = vld [vmem:[#allocation5 + $0x90] sm:$0xff]  ;;  %v214_v30 = vld [vmem:[#allocation5 + $0x98] sm:$0xff] }
  0x2e   :  { %v460_v31 = vpack.c.bf16 %v213_v29, %v212_v28  ;;  %v215_v32 = vld [vmem:[#allocation5 + $0xa0] sm:$0xff]  ;;  %v216_v34 = vld [vmem:[#allocation5 + $0xa8] sm:$0xff]  ;;  %v217_v35 = vld [vmem:[#allocation5 + $0xb0] sm:$0xff]  ;;  %p547_p6 = pnand %p546_p5, %p540_p2 }
  0x2f   :  { %440 = vmatpush3.bf16.msra.mxu1 %v439_v9  ;;  %v463_v33 = vpack.c.bf16 %v215_v32, %v214_v30  ;;  %v466_v36 = vpack.c.bf16 %v217_v35, %v216_v34  ;;  %v218_v37 = vld [vmem:[#allocation5 + $0xb8] sm:$0xff]  ;;  %v219_v38 = vld [vmem:[#allocation5 + $0xc0] sm:$0xff]  ;;  %v220_v40 = vld [vmem:[#allocation5 + $0xc8] sm:$0xff] }
  0x30   :  { %441 = vmatprep.subr.bf16.mxu1 %v573_v1  ;;  %461 = vmatpush3.bf16.msra.mxu0 %v460_v31  ;;  %v469_v39 = vpack.c.bf16 %v219_v38, %v218_v37  ;;  %v221_v41 = vld [vmem:[#allocation5 + $0xd0] sm:$0xff]  ;;  %v320_v43 = vld [vmem:[#allocation5 + $0x108] ss:$0 sm:$0xff]  ;;  %v222_v48 = vld [vmem:[#allocation5 + $0xd8] sm:$0xff] }
  0x31   :  { %462 = vmatprep.subr.bf16.mxu0 %v573_v1  ;;  %v472_v42 = vpack.c.bf16 %v221_v41, %v220_v40  ;;  %v223_v49 = vld [vmem:[#allocation5 + $0xe0] sm:$0xff]  ;;  %v224_v51 = vld [vmem:[#allocation5 + $0xe8] sm:$0xff]  ;;  %v225_v52 = vld [vmem:[#allocation5 + $0xf0] sm:$0xff] }
  0x32   :  { %v475_v50 = vpack.c.bf16 %v223_v49, %v222_v48  ;;  %v478_v53 = vpack.c.bf16 %v225_v52, %v224_v51  ;;  %v226_v54 = vld [vmem:[#allocation5 + $0xf8] sm:$0xff]  ;;  %v227_v55 = vld [vmem:[#allocation5 + $0x100] sm:$0xff]  ;;  %v322_v57 = vld [vmem:[#allocation5 + $0x109] ss:$0 sm:$0xff] }
  0x33   :  { %443 = vmatpush3.bf16.msra.mxu1 %v442_v12  ;;  %v481_v56 = vpack.c.bf16 %v227_v55, %v226_v54  ;;  %v323_v62 = vld [vmem:[#allocation5 + $0x10a] ss:$0 sm:$0xff] }
  0x34   :  { %444 = vmatprep.subr.bf16.mxu1 %v573_v1  ;;  %464 = vmatpush3.bf16.msra.mxu0 %v463_v33 }
  0x35   :  { %465 = vmatprep.subr.bf16.mxu0 %v573_v1 }
  0x37   :  { %446 = vmatpush3.bf16.msra.mxu1 %v445_v15 }
  0x38   :  { %447 = vmatprep.subr.bf16.mxu1 %v573_v1  ;;  %467 = vmatpush3.bf16.msra.mxu0 %v466_v36 }
  0x39   :  { %468 = vmatprep.subr.bf16.mxu0 %v573_v1 }
  0x3b   :  { %449 = vmatpush3.bf16.msra.mxu1 %v448_v18 }
  0x3c   :  { %450 = vmatprep.subr.bf16.mxu1 %v573_v1  ;;  %470 = vmatpush3.bf16.msra.mxu0 %v469_v39 }
  0x3d   :  { %471 = vmatprep.subr.bf16.mxu0 %v573_v1 }
  0x3f   :  { %452 = vmatpush3.bf16.msra.mxu1 %v451_v21 }
  0x40   :  { %453 = vmatprep.subr.bf16.mxu1 %v573_v1  ;;  %473 = vmatpush3.bf16.msra.mxu0 %v472_v42 }
  0x41   :  { %474 = vmatprep.subr.bf16.mxu0 %v573_v1 }
  0x43   :  { %455 = vmatpush3.bf16.msra.mxu1 %v454_v24 }
  0x44   :  { %456 = vmatprep.subr.bf16.mxu1 %v573_v1  ;;  %476 = vmatpush3.bf16.msra.mxu0 %v475_v50 }
  0x45   :  { %477 = vmatprep.subr.bf16.mxu0 %v573_v1 }
  0x47   :  { %458 = vmatpush3.bf16.msra.mxu1 %v457_v27 }
  0x48   :  { %479 = vmatpush3.bf16.msra.mxu0 %v478_v53 }
  0x49   :  { %480 = vmatprep.subr.bf16.mxu0 %v573_v1 }
  0x4c   :  { %482 = vmatpush3.bf16.msra.mxu0 %v481_v56 }
  0xfd   :  { %v115_v44 = vpop.f32.mrb[0].mxu0 }
  0xfe   :  { %v116_v45 = vadd.f32 %v320_v43, %v115_v44  ;;  %v364_v46 = vpop.f32.mrb[1].mxu0 }
 0x100   :  { %491 = vtanh.f32 %v116_v45 }
 0x10a   :  { %v492_v47 = vpop.eup %491 }
 0x10b   :  { %398 = vmatmul.mubr.f32.vlgmr.msra.gmra.mrb[0].mxu1 %v492_v47 }
 0x1de   :  { %v207_v58 = vpop.f32.mrb[0].mxu1 }
 0x1df   :  { %v208_v59 = vadd.f32 %v322_v57, %v207_v58  ;;  %v399_v60 = vpop.f32.mrb[1].mxu1 }
 0x1e1   :  { %493 = vtanh.f32 %v208_v59 }
 0x1eb   :  { %v494_v61 = vpop.eup %493 }
 0x1ec   :  { %433 = vmatmul.mubr.f32.vlgmr.msra.gmra.mrb[2].mxu0 %v494_v61 }
 0x2bf   :  { %v299_v63 = vpop.f32.mrb[2].mxu0 }
 0x2c0   :  { %v300_v0 = vadd.f32 %v323_v62, %v299_v63  ;;  %v434_v2 = vpop.f32.mrb[3].mxu0 }
 0x2c2   :  { %303 = vst [vmem:[#allocation7] sm:$0xf] %v300_v0 }
 0x2c3   :  { %550 = shalt.err (!%p547_p6)
}
 0x2c4   :  { %s551_s10 = scalar_lea.hbm %s654_s2, 64 }
 0x2c5   :  { %p552_p7 = scmp.ne.s32.totalorder %s654_s2, %s551_s10  ;;  %p555_p8 = scmp.lt.u32.totalorder %s551_s10, %s654_s2 }
 0x2c7   :  { %p557_p9 = pnand %p555_p8, %p552_p7 }
 0x2c9   :  { %560 = shalt.err (!%p557_p9)
}
 0x2ca   :  { %313 = dma.vmem_to_hbm [thread:$0]  %s311_s6, 64, %s654_s2, [#allocation4]  }
 0x2cb   :  { %565 = dma.done.wait [#allocation4], 64  }
 0x2cc   :  { %566 = vsyncadd [#allocation4], 4294967232 }
 0x2cd   :  { %317 = vsyncpa [#allocation3], 1 }
 0x2ce   :  { %318 = vsyncpa [#allocation6], 1 }
 0x2cf   :  { %319 = vsyncpa [#allocation4], 1 }

</bundles_post_ra>
